<compile_context>
chip_gen: v6e
topology: v6e:2x2x1
jax: 0.10.0
libtpu: 0.0.40
codegen_flags: <defaults>
</compile_context>

<pallas_src>
import functools

import jax
import jax.numpy as jnp
from jax import lax
from jax.experimental import pallas as pl
from jax.experimental.pallas import tpu as pltpu


def _cdiv(a, b):
    return -(-a // b)


def _round_up(a, b):
    return _cdiv(a, b) * b


def _vmem_capacity_bytes():
    """Per-core VMEM capacity; conservative 64 MiB (v7x) fallback."""
    try:
        cap = getattr(pltpu.get_tpu_info(), "vmem_capacity_bytes", None)
        if cap:
            return int(cap)
    except Exception:  # noqa: BLE001 - best-effort hardware query
        pass
    return 64 * 1024 * 1024


def _num_row_shards():
    """TensorCores per JAX device: 2 on megacore chips (v4/v5p/v7x), else 1."""
    try:
        kind = jax.devices()[0].device_kind.lower()
    except Exception:  # noqa: BLE001
        return 1
    if "lite" in kind or "v5e" in kind or "v6" in kind:
        return 1                      # v5e / v6e: single TensorCore
    if "v7" in kind or "v4" in kind or "v5" in kind:
        return 2                      # v7x / v4 / v5p megacore
    return 1


def _pick_tile_n(n, c, itemsize, vmem_limit_bytes):
    """Largest row tile whose inputs *and* f32 intermediates fit the VMEM limit.

    Per-row footprint:
      inputs:        2 features x 2 pipeline buffers x C x itemsize
      intermediates: ~5 f32 (tile, C) temporaries (cast, shifted, exp,
                     shared iota/one-hot) -- conservative upper bound.
    """
    per_row = c * (4 * itemsize + 5 * 4)
    budget = max(vmem_limit_bytes - 8 * 1024 * 1024, 2 * 1024 * 1024)
    tile = budget // per_row
    tile = max(16, (tile // 16) * 16)         # multiple of 16 (bf16 sublane packing)
    return int(min(tile, _round_up(n, 16)))


def _row_ce_sum(logits, onehot, valid):
    """Sum over valid rows of -log_softmax(logits)[row, label[row]] (float32)."""
    x = logits.astype(jnp.float32)
    m = jnp.max(x, axis=-1, keepdims=True)                       # (tile, 1)
    xs = x - m                                                   # shifted once, reused
    sumexp = jnp.sum(jnp.exp(xs), axis=-1, keepdims=True)        # (tile, 1)
    # gather-free pick of the label logit via the shared one-hot mask:
    #   lse - picked == log(sumexp) - (picked - m)
    picked_shifted = jnp.sum(jnp.where(onehot, xs, 0.0), axis=-1, keepdims=True)
    per_row = jnp.log(sumexp) - picked_shifted                   # (tile, 1)
    per_row = jnp.where(valid, per_row, 0.0)                     # mask padded rows
    return jnp.sum(per_row)


def _unicl_ce_kernel(text_ref, image_ref, labels_ref, out_ref, acc_ref, *, n_valid):
    ti = pl.program_id(1)
    tiles_per_shard = pl.num_programs(1)
    tile_rows, c = text_ref.shape

    @pl.when(ti == 0)
    def _init():
        acc_ref[...] = jnp.zeros_like(acc_ref)

    # Global (logical) row index of each row in this tile; masks both the
    # ragged tail of the batch and fully-redundant (clamped) blocks.
    base = (pl.program_id(0) * tiles_per_shard + ti) * tile_rows
    row_ids = base + lax.broadcasted_iota(jnp.int32, (tile_rows, 1), 0)
    valid = row_ids < n_valid

    # One-hot label mask, computed once per tile and shared by both passes.
    labels_col = labels_ref[...]                                  # (tile, 1) int32
    class_ids = lax.broadcasted_iota(jnp.int32, (tile_rows, c), 1)
    onehot = class_ids == labels_col                              # (tile, C) bool

    tile_sum = (_row_ce_sum(image_ref[...], onehot, valid)
                + _row_ce_sum(text_ref[...], onehot, valid))
    acc_ref[...] += tile_sum       # scalar broadcast over the (1, 8, 128) scratch

    @pl.when(ti == tiles_per_shard - 1)
    def _store():
        out_ref[...] = acc_ref[...]   # single lane-dense store per core shard


def unicl_cross_entropy(text_features, image_features, labels, logit_scale=2.659):
    """Matches CrossEntropy.forward(text_features, image_features, logit_scale, labels).

    Note: as in the PyTorch reference, logit_scale is accepted but unused.
    Labels must be valid class ids in [0, C): out-of-range labels silently
    yield loss == logsumexp for that row (no ignore_index handling).
    """
    del logit_scale
    n, c = text_features.shape
    assert image_features.shape == (n, c)
    assert image_features.dtype == text_features.dtype
    itemsize = jnp.dtype(text_features.dtype).itemsize

    vmem_limit = (_vmem_capacity_bytes() // 8) * 7    # 112 MiB on v5e/v6e, 56 MiB on v7x
    tile_n = _pick_tile_n(n, c, itemsize, vmem_limit)

    n_shards = _num_row_shards()
    n_data_tiles = _cdiv(n, tile_n)
    tiles_per_shard = _cdiv(n_data_tiles, n_shards)
    last_tile = n_data_tiles - 1

    labels2d = labels.astype(jnp.int32).reshape(n, 1)

    # Clamp logical block indices that fall entirely past the data to the last
    # real block (never issue an out-of-bounds DMA); the kernel's row mask
    # zeroes their contribution.
    def row_index(ci, ti):
        return (jnp.minimum(ci * tiles_per_shard + ti, last_tile), 0)

    feat_spec = pl.BlockSpec((tile_n, c), row_index)
    lab_spec = pl.BlockSpec((tile_n, 1), row_index)
    out_spec = pl.BlockSpec((1, 8, 128), lambda ci, ti: (ci, 0, 0))

    cost = pl.CostEstimate(
        flops=int(8 * n * c),
        transcendentals=int(2 * n * c),
        bytes_accessed=int(2 * n * c * itemsize + 4 * n + n_shards * 8 * 128 * 4),
    )

    out = pl.pallas_call(
        functools.partial(_unicl_ce_kernel, n_valid=n),
        out_shape=jax.ShapeDtypeStruct((n_shards, 8, 128), jnp.float32),
        grid=(n_shards, tiles_per_shard),
        in_specs=[feat_spec, feat_spec, lab_spec],
        out_specs=out_spec,
        scratch_shapes=[pltpu.VMEM((1, 8, 128), jnp.float32)],
        compiler_params=pltpu.CompilerParams(
            dimension_semantics=("parallel", "arbitrary"),
            vmem_limit_bytes=int(vmem_limit)),
        cost_estimate=cost,
    )(text_features, image_features, labels2d)

    partials = out[:, 0, 0]                      # one partial sum per core shard
    return jnp.sum(partials) / (2.0 * n)         # (image_sum + text_sum) / N / 2


if __name__ == "__main__":
    key = jax.random.PRNGKey(0)
    k1, k2, k3 = jax.random.split(key, 3)

    N, C = 8, 32  # batch, num_classes
    text_features = jax.random.normal(k1, (N, C), dtype=jnp.float32)
    image_features = jax.random.normal(k2, (N, C), dtype=jnp.float32)
    labels = jax.random.randint(k3, (N,), 0, C, dtype=jnp.int32)

    total_loss = unicl_cross_entropy(text_features, image_features, labels)
    jax.block_until_ready(total_loss)

    # Pure-JAX reference of the same semantics.
    def ref_ce(logits, lbls):
        logp = jax.nn.log_softmax(logits.astype(jnp.float32), axis=-1)
        return -jnp.mean(logp[jnp.arange(logits.shape[0]), lbls])

    ref = (ref_ce(image_features, labels) + ref_ce(text_features, labels)) / 2
    assert jnp.allclose(total_loss, ref, atol=1e-5, rtol=1e-5), (total_loss, ref)

    # bf16 feature path (halves HBM traffic); reference uses the same bf16 inputs.
    text_bf = text_features.astype(jnp.bfloat16)
    image_bf = image_features.astype(jnp.bfloat16)
    loss_bf = unicl_cross_entropy(text_bf, image_bf, labels)
    jax.block_until_ready(loss_bf)
    ref_bf = (ref_ce(image_bf, labels) + ref_ce(text_bf, labels)) / 2
    assert jnp.allclose(loss_bf, ref_bf, atol=1e-4, rtol=1e-4), (loss_bf, ref_bf)

    # Uneven batch size (exercises the ragged-block / row-mask path, no padding copies).
    N2 = 13
    t2 = jax.random.normal(k1, (N2, C), dtype=jnp.float32)
    i2 = jax.random.normal(k2, (N2, C), dtype=jnp.float32)
    l2 = jax.random.randint(k3, (N2,), 0, C, dtype=jnp.int32)
    loss2 = unicl_cross_entropy(t2, i2, l2)
    jax.block_until_ready(loss2)
    ref2 = (ref_ce(i2, l2) + ref_ce(t2, l2)) / 2
    assert jnp.allclose(loss2, ref2, atol=1e-5, rtol=1e-5), (loss2, ref2)

    print("KERNEL_OK")
</pallas_src>

<mosaic_0001>
module attributes {stable_mosaic.version = 11 : i64} {
  func.func @_unicl_ce_kernel(%arg0: i32, %arg1: i32, %arg2: memref<16x32xf32, #tpu.memory_space<vmem>>, %arg3: memref<16x32xf32, #tpu.memory_space<vmem>>, %arg4: memref<16x1xi32, #tpu.memory_space<vmem>>, %arg5: memref<1x8x128xf32, #tpu.memory_space<vmem>>, %arg6: memref<1x8x128xf32, #tpu.memory_space<vmem>>) attributes {dimension_semantics = [#tpu.dimension_semantics<parallel>, #tpu.dimension_semantics<arbitrary>], iteration_bounds = array<i64: 1, 1>, scalar_prefetch = 0 : i64, scratch_operands = 1 : i64, tpu.core_type = #tpu.core_type<tc>, window_params = [{transform_indices = @transform_0, window_bounds = array<i64: 16, 32>}, {transform_indices = @transform_1, window_bounds = array<i64: 16, 32>}, {transform_indices = @transform_2, window_bounds = array<i64: 16, 1>}, {transform_indices = @transform_3, window_bounds = array<i64: 1, 8, 128>}]} {
    %c0_i32 = arith.constant 0 : i32
    %0 = arith.cmpi eq, %arg1, %c0_i32 : i32
    %1 = arith.extui %0 : i1 to i32
    %c0_i32_0 = arith.constant 0 : i32
    %2 = arith.cmpi ne, %1, %c0_i32_0 : i32
    scf.if %2 {
      %cst_25 = arith.constant 0.000000e+00 : f32
      %63 = vector.broadcast %cst_25 : f32 to vector<1x8x128xf32>
      %c0_26 = arith.constant 0 : index
      %c0_27 = arith.constant 0 : index
      %c0_28 = arith.constant 0 : index
      %64 = vector.load %arg6[%c0_26, %c0_27, %c0_28] : memref<1x8x128xf32, #tpu.memory_space<vmem>>, vector<1x8x128xf32>
      tpu.vector_store %arg6[%c0_26, %c0_27, %c0_28], %63 {strides = array<i32>} : memref<1x8x128xf32, #tpu.memory_space<vmem>>, vector<1x8x128xf32>,
    } else {
    }
    %c1_i32 = arith.constant 1 : i32
    %3 = arith.muli %arg0, %c1_i32 : i32
    %4 = arith.addi %3, %arg1 : i32
    %c16_i32 = arith.constant 16 : i32
    %5 = arith.muli %4, %c16_i32 : i32
    %6 = tpu.iota {dimensions = array<i32: 0>} : vector<16x1xi32>
    %7 = vector.broadcast %5 : i32 to vector<16x1xi32>
    %8 = arith.addi %7, %6 : vector<16x1xi32>
    %c8_i32 = arith.constant 8 : i32
    %9 = vector.broadcast %c8_i32 : i32 to vector<16x1xi32>
    %10 = arith.cmpi slt, %8, %9 : vector<16x1xi32>
    %c0 = arith.constant 0 : index
    %c0_1 = arith.constant 0 : index
    %11 = vector.load %arg4[%c0, %c0_1] : memref<16x1xi32, #tpu.memory_space<vmem>>, vector<16x1xi32>
    %12 = tpu.iota {dimensions = array<i32: 1>} : vector<16x32xi32>
    %13 = vector.broadcast %11 : vector<16x1xi32> to vector<16x32xi32>
    %14 = arith.cmpi eq, %12, %13 : vector<16x32xi32>
    %c0_2 = arith.constant 0 : index
    %c0_3 = arith.constant 0 : index
    %15 = vector.load %arg3[%c0_2, %c0_3] : memref<16x32xf32, #tpu.memory_space<vmem>>, vector<16x32xf32>
    %cst = arith.constant dense<0xFF800000> : vector<16xf32>
    %16 = vector.multi_reduction <maximumf>, %15, %cst [1] : vector<16x32xf32> to vector<16xf32>
    %17 = vector.shape_cast %16 : vector<16xf32> to vector<16x1xf32>
    %18 = vector.broadcast %17 : vector<16x1xf32> to vector<16x32xf32>
    %19 = arith.subf %15, %18 : vector<16x32xf32>
    %20 = math.exp %19 : vector<16x32xf32>
    %cst_4 = arith.constant dense<0.000000e+00> : vector<16xf32>
    %21 = vector.multi_reduction <add>, %20, %cst_4 [1] : vector<16x32xf32> to vector<16xf32>
    %22 = vector.shape_cast %21 : vector<16xf32> to vector<16x1xf32>
    %cst_5 = arith.constant 0.000000e+00 : f32
    %23 = vector.broadcast %cst_5 : f32 to vector<16x32xf32>
    %24 = arith.select %14, %19, %23 : vector<16x32xi1>, vector<16x32xf32>
    %cst_6 = arith.constant dense<0.000000e+00> : vector<16xf32>
    %25 = vector.multi_reduction <add>, %24, %cst_6 [1] : vector<16x32xf32> to vector<16xf32>
    %26 = vector.shape_cast %25 : vector<16xf32> to vector<16x1xf32>
    %27 = math.log %22 : vector<16x1xf32>
    %28 = arith.subf %27, %26 : vector<16x1xf32>
    %cst_7 = arith.constant 0.000000e+00 : f32
    %29 = vector.broadcast %cst_7 : f32 to vector<16x1xf32>
    %30 = arith.select %10, %28, %29 : vector<16x1xi1>, vector<16x1xf32>
    %31 = vector.shape_cast %30 : vector<16x1xf32> to vector<1x16x1xf32>
    %cst_8 = arith.constant dense<0.000000e+00> : vector<1xf32>
    %32 = vector.multi_reduction <add>, %31, %cst_8 [1, 2] : vector<1x16x1xf32> to vector<1xf32>
    %33 = vector.shape_cast %32 : vector<1xf32> to vector<1x1x1xf32>
    %34 = vector.extract %33[0, 0, 0] : f32 from vector<1x1x1xf32>
    %c0_9 = arith.constant 0 : index
    %c0_10 = arith.constant 0 : index
    %35 = vector.load %arg2[%c0_9, %c0_10] : memref<16x32xf32, #tpu.memory_space<vmem>>, vector<16x32xf32>
    %cst_11 = arith.constant dense<0xFF800000> : vector<16xf32>
    %36 = vector.multi_reduction <maximumf>, %35, %cst_11 [1] : vector<16x32xf32> to vector<16xf32>
    %37 = vector.shape_cast %36 : vector<16xf32> to vector<16x1xf32>
    %38 = vector.broadcast %37 : vector<16x1xf32> to vector<16x32xf32>
    %39 = arith.subf %35, %38 : vector<16x32xf32>
    %40 = math.exp %39 : vector<16x32xf32>
    %cst_12 = arith.constant dense<0.000000e+00> : vector<16xf32>
    %41 = vector.multi_reduction <add>, %40, %cst_12 [1] : vector<16x32xf32> to vector<16xf32>
    %42 = vector.shape_cast %41 : vector<16xf32> to vector<16x1xf32>
    %cst_13 = arith.constant 0.000000e+00 : f32
    %43 = vector.broadcast %cst_13 : f32 to vector<16x32xf32>
    %44 = arith.select %14, %39, %43 : vector<16x32xi1>, vector<16x32xf32>
    %cst_14 = arith.constant dense<0.000000e+00> : vector<16xf32>
    %45 = vector.multi_reduction <add>, %44, %cst_14 [1] : vector<16x32xf32> to vector<16xf32>
    %46 = vector.shape_cast %45 : vector<16xf32> to vector<16x1xf32>
    %47 = math.log %42 : vector<16x1xf32>
    %48 = arith.subf %47, %46 : vector<16x1xf32>
    %cst_15 = arith.constant 0.000000e+00 : f32
    %49 = vector.broadcast %cst_15 : f32 to vector<16x1xf32>
    %50 = arith.select %10, %48, %49 : vector<16x1xi1>, vector<16x1xf32>
    %51 = vector.shape_cast %50 : vector<16x1xf32> to vector<1x16x1xf32>
    %cst_16 = arith.constant dense<0.000000e+00> : vector<1xf32>
    %52 = vector.multi_reduction <add>, %51, %cst_16 [1, 2] : vector<1x16x1xf32> to vector<1xf32>
    %53 = vector.shape_cast %52 : vector<1xf32> to vector<1x1x1xf32>
    %54 = vector.extract %53[0, 0, 0] : f32 from vector<1x1x1xf32>
    %55 = arith.addf %34, %54 : f32
    %c0_17 = arith.constant 0 : index
    %c0_18 = arith.constant 0 : index
    %c0_19 = arith.constant 0 : index
    %56 = vector.load %arg6[%c0_17, %c0_18, %c0_19] : memref<1x8x128xf32, #tpu.memory_space<vmem>>, vector<1x8x128xf32>
    %57 = vector.broadcast %55 : f32 to vector<1x8x128xf32>
    %58 = arith.addf %56, %57 : vector<1x8x128xf32>
    %c0_20 = arith.constant 0 : index
    %c0_21 = arith.constant 0 : index
    %c0_22 = arith.constant 0 : index
    %59 = vector.load %arg6[%c0_20, %c0_21, %c0_22] : memref<1x8x128xf32, #tpu.memory_space<vmem>>, vector<1x8x128xf32>
    tpu.vector_store %arg6[%c0_20, %c0_21, %c0_22], %58 {strides = array<i32>} : memref<1x8x128xf32, #tpu.memory_space<vmem>>, vector<1x8x128xf32>,
    %c0_i32_23 = arith.constant 0 : i32
    %60 = arith.cmpi eq, %arg1, %c0_i32_23 : i32
    %61 = arith.extui %60 : i1 to i32
    %c0_i32_24 = arith.constant 0 : i32
    %62 = arith.cmpi ne, %61, %c0_i32_24 : i32
    scf.if %62 {
      %c0_25 = arith.constant 0 : index
      %c0_26 = arith.constant 0 : index
      %c0_27 = arith.constant 0 : index
      %63 = vector.load %arg6[%c0_25, %c0_26, %c0_27] : memref<1x8x128xf32, #tpu.memory_space<vmem>>, vector<1x8x128xf32>
      %c0_28 = arith.constant 0 : index
      %c0_29 = arith.constant 0 : index
      %c0_30 = arith.constant 0 : index
      %64 = vector.load %arg5[%c0_28, %c0_29, %c0_30] : memref<1x8x128xf32, #tpu.memory_space<vmem>>, vector<1x8x128xf32>
      tpu.vector_store %arg5[%c0_28, %c0_29, %c0_30], %63 {strides = array<i32>} : memref<1x8x128xf32, #tpu.memory_space<vmem>>, vector<1x8x128xf32>,
    } else {
    }
    return
  }
  func.func @transform_0(%arg0: i32, %arg1: i32) -> (i32, i32) {
    %c1_i32 = arith.constant 1 : i32
    %0 = arith.muli %arg0, %c1_i32 : i32
    %1 = arith.addi %0, %arg1 : i32
    %c0_i32 = arith.constant 0 : i32
    %2 = arith.minsi %1, %c0_i32 : i32
    %c0_i32_0 = arith.constant 0 : i32
    %c0_i32_1 = arith.constant 0 : i32
    return %2, %c0_i32_0 : i32, i32
  }
  func.func @transform_1(%arg0: i32, %arg1: i32) -> (i32, i32) {
    %c1_i32 = arith.constant 1 : i32
    %0 = arith.muli %arg0, %c1_i32 : i32
    %1 = arith.addi %0, %arg1 : i32
    %c0_i32 = arith.constant 0 : i32
    %2 = arith.minsi %1, %c0_i32 : i32
    %c0_i32_0 = arith.constant 0 : i32
    %c0_i32_1 = arith.constant 0 : i32
    return %2, %c0_i32_0 : i32, i32
  }
  func.func @transform_2(%arg0: i32, %arg1: i32) -> (i32, i32) {
    %c1_i32 = arith.constant 1 : i32
    %0 = arith.muli %arg0, %c1_i32 : i32
    %1 = arith.addi %0, %arg1 : i32
    %c0_i32 = arith.constant 0 : i32
    %2 = arith.minsi %1, %c0_i32 : i32
    %c0_i32_0 = arith.constant 0 : i32
    %c0_i32_1 = arith.constant 0 : i32
    return %2, %c0_i32_0 : i32, i32
  }
  func.func @transform_3(%arg0: i32, %arg1: i32) -> (i32, i32, i32) {
    %c0_i32 = arith.constant 0 : i32
    %c0_i32_0 = arith.constant 0 : i32
    %c0_i32_1 = arith.constant 0 : i32
    return %arg0, %c0_i32, %c0_i32_0 : i32, i32, i32
  }
}

</mosaic_0001>

<bundles_post_ra>
// kernel: tpu_custom_call.1
= control target key start
LH: loop header
LB: loop body
LE: loop exit
PB: predicated region body
PF: predicated region fallthrough
CT: control target
= control target key end

     0   :  { %8 = vsyncpa [#allocation4], 0  ;;  %s399_s0 = inlined_call_operand.vmem [shape: f32[8,32], index: 0, kind: input, shape index: {}]   ;;  %s400_s1 = inlined_call_operand.hbm [shape: f32[8,32], index: 1, kind: input, shape index: {}]   ;;  %s401_s2 = inlined_call_operand.vmem [shape: s32[8,1], index: 2, kind: input, shape index: {}]   ;;  %s402_s3 = inlined_call_operand.hbm [shape: f32[1,8,128], index: 3, kind: output, shape index: {}]  }
   0x1   :  { %9 = vsyncpa [#allocation5], 0 }
   0x2   :  { %38 = vsyncadd [#allocation4], 128  ;;  %s356_s12 = smov [#allocation3]  }
   0x3   :  { %s43_s13 = sshll.u32 %s356_s12, 4  ;;  %s44_s13 = int_to_ptr.vmem [resolvable:$true] %s43_s13 }
   0x4   :  { %s320_s14 = scalar_lea.vmem %s44_s13, 128  ;;  %s324_s15 = scalar_lea.vmem %s44_s13, 256 }
   0x5   :  { %p321_p0 = scmp.ne.s32.totalorder %s44_s13, %s320_s14  ;;  %p325_p1 = scmp.lt.s32.totalorder %s44_s13, %s44_s13 }
   0x6   :  { %p326_p2 = scmp.lt.s32.totalorder %s324_s15, %s320_s14 }
   0x8   :  { %p327_p3 = por %p326_p2, %p325_p1 }
   0xa   :  { %p328_p4 = pnand %p327_p3, %p321_p0 }
   0xc   :  { %331 = shalt.err (!%p328_p4)
}
   0xd   :  { %s357_s16 = smov 128   ;;  %s358_s17 = smov 8  }
   0xe   :  { %49 = dma.hbm_to_vmem [thread:$0]  %s400_s1, 128, %s44_s13, [#allocation4], %s357_s16, %s357_s16, %s358_s17  }
   0xf   :  { %352 = dma.done.wait [#allocation4], 256  }
  0x10   :  { %353 = vsyncadd [#allocation4], 4294967040  ;;  %v359_v0 = vmov 0   ;;  %vm158_vm0 = vcmask 261120   ;;  %v156_v1 = vld [vmem:[#allocation3] sm:$0xff]  ;;  %v146_v12 = vlaneseq  ;;  %vm193_vm2 = vcmask 7168  }
  0x11   :  { %302 = vset.pattern.permute.xlu1 %v359_v0  ;;  %303 = vset.pattern.permute.xlu0 %v359_v0  ;;  %v206_v2 = vld [vmem:[%s399_s0] sm:$0xff]  ;;  %v159_v4 = vsel %vm158_vm0, %v156_v1, -inf  ;;  %s360_s1 = smov [#allocation6]  }
  0x12   :  { %v144_v3 = vld [vmem:[%s401_s2] sm:$0xff]  ;;  %160 = vmax.xlane.f32.xlu0 %v159_v4  ;;  %v208_v5 = vsel %vm158_vm0, %v206_v2, -inf  ;;  %v147_v13 = vand.u32 127, %v146_v12  ;;  %s270_s2 = sshll.u32 %s360_s1, 4  ;;  %s271_s2 = int_to_ptr.vmem [resolvable:$true] %s270_s2 }
  0x13   :  { %149 = vperm.xlu1 %302, %v144_v3   ;;  %s332_s26 = scalar_lea.vmem %s271_s2, 128  ;;  %p337_p6 = scmp.lt.s32.totalorder %s271_s2, %s271_s2 }
  0x14   :  { %p333_p5 = scmp.ne.s32.totalorder %s271_s2, %s332_s26  ;;  %p338_p7 = scmp.lt.s32.totalorder %s332_s26, %s332_s26 }
  0x16   :  { %209 = vmax.xlane.f32.xlu0 %v208_v5  ;;  %p339_p8 = por %p338_p7, %p337_p6 }
  0x18   :  { %p340_p9 = pnand %p339_p8, %p333_p5 }
  0x8e   :  { %v150_v15 = vpop.permute.xlu1 %149 }
  0x8f   :  { %vm154_vm1 = vcmp.eq.s32.totalorder %v147_v13, %v150_v15 }
  0x9b   :  { %v161_v6 = vpop.xlane.xlu0 %160 }
  0x9c   :  { %v165_v7 = vsub.f32 %v156_v1, %v161_v6 }
  0x9e   :  { %v167_v8 = vmul.f32 1.442695, %v165_v7  ;;  %v177_v19 = vsel %vm154_vm1, %v165_v7, 0.0 }
  0x9f   :  { %v210_v9 = vpop.xlane.xlu0 %209  ;;  %v179_v20 = vsel %vm158_vm0, %v177_v19, 0.0 }
  0xa0   :  { %304 = vpow2.f32 %v167_v8  ;;  %v214_v10 = vsub.f32 %v206_v2, %v210_v9 }
  0xa2   :  { %v216_v11 = vmul.f32 1.442695, %v214_v10  ;;  %v226_v21 = vsel %vm154_vm1, %v214_v10, 0.0 }
  0xa3   :  { %v228_v22 = vsel %vm158_vm0, %v226_v21, 0.0 }
  0xa4   :  { %306 = vpow2.f32 %v216_v11 }
  0xad   :  { %v305_v14 = vpop.eup %304 }
  0xae   :  { %v171_v16 = vsel %vm158_vm0, %v305_v14, 0.0 }
  0xaf   :  { %172 = vadd.xlane.f32.xlu1 %v171_v16 }
  0xb1   :  { %v307_v17 = vpop.eup %306 }
  0xb2   :  { %v220_v18 = vsel %vm158_vm0, %v307_v17, 0.0 }
  0xb3   :  { %221 = vadd.xlane.f32.xlu0 %v220_v18 }
  0xb7   :  { %180 = vadd.xlane.f32.xlu0 %v179_v20 }
  0xbb   :  { %229 = vadd.xlane.f32.xlu0 %v228_v22 }
 0x138   :  { %v173_v23 = vpop.xlane.xlu1 %172 }
 0x139   :  { %308 = vlog2.f32 %v173_v23 }
 0x13c   :  { %v222_v24 = vpop.xlane.xlu0 %221 }
 0x13d   :  { %310 = vlog2.f32 %v222_v24 }
 0x140   :  { %v181_v26 = vpop.xlane.xlu0 %180 }
 0x144   :  { %v230_v32 = vpop.xlane.xlu0 %229 }
 0x146   :  { %v309_v25 = vpop.eup %308 }
 0x147   :  { %v186_v27 = vmul.f32 0.6931472, %v309_v25 }
 0x149   :  { %v189_v28 = vsub.f32 %v186_v27, %v181_v26 }
 0x14a   :  { %v311_v29 = vpop.eup %310 }
 0x14b   :  { %v235_v30 = vmul.f32 0.6931472, %v311_v29  ;;  %v194_v31 = vsel %vm193_vm2, %v189_v28, 0.0 }
 0x14c   :  { %197 = vadd.xlane.f32.xlu0 %v194_v31 }
 0x14d   :  { %v238_v33 = vsub.f32 %v235_v30, %v230_v32 }
 0x14f   :  { %v242_v34 = vsel %vm193_vm2, %v238_v33, 0.0 }
 0x150   :  { %245 = vadd.xlane.f32.xlu0 %v242_v34 }
 0x1d5   :  { %v198_v35 = vpop.xlane.xlu0 %197 }
 0x1d6   :  { %v199_v36 = vrot.slane %v198_v35, 4 }
 0x1d8   :  { %v200_v37 = vadd.f32 %v199_v36, %v198_v35 }
 0x1d9   :  { %v246_v38 = vpop.xlane.xlu0 %245 }
 0x1da   :  { %v201_v39 = vrot.slane %v200_v37, 2  ;;  %v247_v40 = vrot.slane %v246_v38, 4 }
 0x1dc   :  { %v248_v41 = vadd.f32 %v247_v40, %v246_v38  ;;  %v202_v42 = vadd.f32 %v201_v39, %v200_v37 }
 0x1de   :  { %v249_v43 = vrot.slane %v248_v41, 2  ;;  %v203_v44 = vrot.slane %v202_v42, 1 }
 0x1e0   :  { %v250_v45 = vadd.f32 %v249_v43, %v248_v41  ;;  %v204_v46 = vadd.f32 %v203_v44, %v202_v42 }
 0x1e2   :  { %293 = vpush %v204_v46  ;;  %v251_v47 = vrot.slane %v250_v45, 1 }
 0x1e4   :  { %v252_v48 = vadd.f32 %v251_v47, %v250_v45 }
 0x1e6   :  { %295 = vpush %v252_v48 }
 0x213   :  { %s294_s0 = spop %293 }
 0x217   :  { %s296_s24 = spop %295 }
 0x218   :  { %s254_s25 = sadd.f32 %s296_s24, %s294_s0 }
 0x21a   :  { %v256_v49 = vstv %s254_s25 }
 0x21b   :  { %263 = vst [vmem:[#allocation6] sm:$0xff] %v256_v49 }
 0x21c   :  { %343 = shalt.err (!%p340_p9)
}
 0x21d   :  { %273 = dma.vmem_to_hbm [thread:$0]  %s271_s2, 128, %s402_s3, [#allocation5]  }
 0x21e   :  { %354 = dma.done.wait [#allocation5], 128  }
 0x21f   :  { %355 = vsyncadd [#allocation5], 4294967168 }
 0x220   :  { %277 = vsyncpa [#allocation4], 1 }
 0x221   :  { %278 = vsyncpa [#allocation5], 1 }

</bundles_post_ra>
